<compile_context>
chip_gen: v7x
topology: tpu7x:2x2x1
jax: 0.10.0
libtpu: 0.0.40
codegen_flags: <defaults>
</compile_context>

<pallas_src>
import functools

import jax
import jax.numpy as jnp
from jax.experimental import pallas as pl
from jax.experimental.pallas import tpu as pltpu


def _round_up(x, m):
    return (x + m - 1) // m * m


def _entity_masked_loss_kernel(x_ref, t_ref, m_ref, o_ref, num_ref, den_ref,
                               *, loss_type, batch, n_entities, tb, tn):
    i = pl.program_id(0)            # B-tile index ("parallel")
    j = pl.program_id(1)            # N-tile index (reduction, trailing)
    nj = pl.num_programs(1)

    # Zero per-row accumulators at the start of each N sweep.
    @pl.when(j == 0)
    def _():
        num_ref[...] = jnp.zeros_like(num_ref)
        den_ref[...] = jnp.zeros_like(den_ref)

    # Load native dtype, cast to f32 in-kernel (v5e VPU has no bf16 math).
    x = x_ref[...].astype(jnp.float32)   # (tb, tn), lane-dense
    t = t_ref[...].astype(jnp.float32)
    m = m_ref[...].astype(jnp.float32)

    # Ragged-tile validity: the grid uses cdiv, so the last B/N blocks may
    # hang over the array; their VMEM contents are undefined and must be
    # masked before any reduction.
    row = i * tb + jax.lax.broadcasted_iota(jnp.int32, (tb, tn), 0)
    col = j * tn + jax.lax.broadcasted_iota(jnp.int32, (tb, tn), 1)
    valid = jnp.logical_and(row < batch, col < n_entities)

    # Elementwise loss (reduction='none') on channel 0 only.
    if loss_type == "mse":
        le = (x - t) * (x - t)
    elif loss_type == "bce":
        # Numerically stable BCEWithLogits: max(x,0) - x*t + log1p(exp(-|x|))
        le = jnp.maximum(x, 0.0) - x * t + jnp.log1p(jnp.exp(-jnp.abs(x)))
    else:
        raise ValueError(f"unknown loss_type {loss_type!r}")

    m = jnp.where(valid, m, 0.0)
    le = jnp.where(valid, le, 0.0)    # kill OOB garbage/NaN before the sums

    # Online per-row reductions (2-D keepdims intermediates).
    num_ref[...] += jnp.sum(le * m, axis=-1, keepdims=True)   # (tb, 1)
    den_ref[...] += jnp.sum(m, axis=-1, keepdims=True)        # (tb, 1)

    # End of the N sweep for this B tile: normalize rows and emit this tile's
    # partial sum (replicated across its tile-aligned output block).
    @pl.when(j == nj - 1)
    def _():
        rowv = (i * tb
                + jax.lax.broadcasted_iota(jnp.int32, (tb, 1), 0)) < batch
        num = num_ref[...]                            # 0 for padded rows
        den = jnp.where(rowv, den_ref[...], 1.0)      # padded rows -> 0/1 = 0
        per_row = num / den   # real all-zero-mask rows keep 0/0 = NaN parity
        tile_sum = jnp.sum(per_row, keepdims=True)    # (1, 1)
        o_ref[...] = jnp.broadcast_to(tile_sum.reshape(1, 1, 1), o_ref.shape)


def entity_masked_loss(inp, target, mask, loss_type="mse", *,
                       block_b=None, block_n=None):
    """Pallas implementation of EntityMaskedLoss.forward.

    inp, target: (B, N, C) (only channel 0 is used) or pre-sliced (B, N).
    mask: (B, N) in any numeric/bool dtype holding 0/1 values.
    Returns a scalar f32.
    """
    assert inp.ndim in (2, 3)
    assert target.shape == inp.shape
    assert mask.ndim == 2

    if inp.ndim == 3:
        # Only channel 0 contributes.  This slice costs one extra HBM pass;
        # producers that can supply channel-0 contiguously should call with
        # 2-D inputs (handled by the else branch) to skip it.
        x0 = inp[..., 0]
        t0 = target[..., 0]
    else:
        x0, t0 = inp, target
    B, N = x0.shape
    assert mask.shape == (B, N)

    # ---- tile selection -------------------------------------------------
    # Target ~2 MiB of f32 per input block while keeping the double-buffered
    # working set (3 inputs x 2 buffers) well under 16 MiB (smallest scoped
    # VMEM default, v5e) and far under v7x's 32 MiB.
    TARGET = 512 * 1024   # elements per block
    if block_n is None:
        tn = min(_round_up(N, 128), 2048)
    else:
        assert block_n % 128 == 0
        tn = block_n
    if block_b is None:
        tb_cap = max(32, min(2048, _round_up(pl.cdiv(TARGET, tn), 32)))
        tb = min(_round_up(B, 32), tb_cap)
        if block_n is None and tb * tn < TARGET:
            # B is small: widen the N tiles instead to keep blocks large.
            tn = min(_round_up(N, 128),
                     max(tn, _round_up(pl.cdiv(TARGET, tb), 128)))
    else:
        assert block_b % 32 == 0   # covers int8/bf16/f32 sublane tiling
        tb = block_b

    grid_b = pl.cdiv(B, tb)
    grid_n = pl.cdiv(N, tn)

    kernel = functools.partial(_entity_masked_loss_kernel,
                               loss_type=loss_type, batch=B, n_entities=N,
                               tb=tb, tn=tn)

    def _nbytes(a):
        return int(a.size) * jnp.dtype(a.dtype).itemsize
    bytes_accessed = (_nbytes(x0) + _nbytes(t0) + _nbytes(mask)
                      + grid_b * 8 * 128 * 4)
    flops = (8 if loss_type == "bce" else 5) * B * N
    transcendentals = (2 * B * N) if loss_type == "bce" else 0

    out = pl.pallas_call(
        kernel,
        out_shape=jax.ShapeDtypeStruct((grid_b, 8, 128), jnp.float32),
        grid_spec=pltpu.PrefetchScalarGridSpec(
            num_scalar_prefetch=0,
            grid=(grid_b, grid_n),
            in_specs=[
                pl.BlockSpec((tb, tn), lambda i, j: (i, j)),
                pl.BlockSpec((tb, tn), lambda i, j: (i, j)),
                pl.BlockSpec((tb, tn), lambda i, j: (i, j)),
            ],
            out_specs=pl.BlockSpec((1, 8, 128), lambda i, j: (i, 0, 0)),
            scratch_shapes=[pltpu.VMEM((tb, 1), jnp.float32),
                            pltpu.VMEM((tb, 1), jnp.float32)],
        ),
        compiler_params=pltpu.CompilerParams(
            # B tiles write disjoint output blocks, so the B axis can be
            # sharded across v7x's two TensorCores; the N axis accumulates
            # into resident scratch and must stay sequential.
            dimension_semantics=("parallel", "arbitrary"),
            vmem_limit_bytes=32 * 1024 * 1024),
        cost_estimate=pl.CostEstimate(flops=int(flops),
                                      transcendentals=int(transcendentals),
                                      bytes_accessed=int(bytes_accessed)),
    )(x0, t0, mask)

    # Per-B-tile partials (each replicated over its (8,128) block); the final
    # sum/mean over a handful of values is a trivial wrapper-side op.
    return jnp.sum(out[:, 0, 0]) / B


def _reference(inp, target, mask, loss_type):
    # Pure-JAX reference mirroring the PyTorch module (mask as f32).
    if loss_type == "mse":
        le = (inp - target) ** 2
    else:
        le = (jnp.maximum(inp, 0.0) - inp * target
              + jnp.log1p(jnp.exp(-jnp.abs(inp))))
    le0 = le[..., 0] if le.ndim == 3 else le
    masked = le0 * mask
    return (masked.sum(-1) / mask.sum(-1)).mean()


if __name__ == "__main__":
    failures = []

    def check(name, got, want, tol=1e-5):
        got = jax.block_until_ready(got)
        if not jnp.allclose(got, want, rtol=tol, atol=tol):
            failures.append(f"{name}: kernel={got} ref={want}")

    key = jax.random.PRNGKey(0)
    k1, k2, k3 = jax.random.split(key, 3)

    # Small case matching the module contract: (B, N, C) inputs, (B, N) mask.
    B, N, C = 2, 16, 8
    inp = jax.random.normal(k1, (B, N, C), dtype=jnp.float32)
    # target in [0, 1] so it is also a valid BCE target.
    target = jax.random.uniform(k2, (B, N, C), dtype=jnp.float32)
    mask_i8 = (jax.random.uniform(k3, (B, N)) > 0.3).astype(jnp.int8)
    mask_i8 = mask_i8.at[:, 0].set(1)     # every row has >=1 active entity
    mask_f32 = mask_i8.astype(jnp.float32)

    for loss_type in ("mse", "bce"):
        out = entity_masked_loss(inp, target, mask_i8, loss_type=loss_type)
        check(loss_type, out, _reference(inp, target, mask_f32, loss_type))

    # bf16 inputs straight from the caller (kernel upcasts on the VPU).
    inp16 = inp.astype(jnp.bfloat16)
    tgt16 = target.astype(jnp.bfloat16)
    out = entity_masked_loss(inp16, tgt16, mask_i8, loss_type="mse")
    check("mse-bf16", out,
          _reference(inp16.astype(jnp.float32), tgt16.astype(jnp.float32),
                     mask_f32, "mse"))

    # Ragged multi-tile case with forced small blocks: exercises the cdiv
    # grid, in-kernel tail masking and the per-B-tile "parallel" output path.
    B2, N2, C2 = 40, 300, 8
    kk1, kk2, kk3 = jax.random.split(jax.random.PRNGKey(1), 3)
    inp2 = jax.random.normal(kk1, (B2, N2, C2), dtype=jnp.float32)
    tgt2 = jax.random.uniform(kk2, (B2, N2, C2), dtype=jnp.float32)
    m2 = (jax.random.uniform(kk3, (B2, N2)) > 0.3).astype(jnp.int8)
    m2 = m2.at[:, 0].set(1)
    for loss_type in ("mse", "bce"):
        out = entity_masked_loss(inp2, tgt2, m2, loss_type=loss_type,
                                 block_b=32, block_n=128)
        check(f"{loss_type}-ragged", out,
              _reference(inp2, tgt2, m2.astype(jnp.float32), loss_type))

    # Pre-sliced channel-0 fast path (producer hands over contiguous (B, N)).
    out = entity_masked_loss(inp[..., 0], target[..., 0], mask_i8,
                             loss_type="mse")
    check("mse-presliced", out, _reference(inp, target, mask_f32, "mse"))

    if failures:
        for f in failures:
            print("MISMATCH", f)
    else:
        print("KERNEL_OK")
</pallas_src>

<mosaic_0001>
module attributes {stable_mosaic.version = 11 : i64} {
  func.func @_entity_masked_loss_kernel(%arg0: i32, %arg1: i32, %arg2: memref<32x128xf32, #tpu.memory_space<vmem>>, %arg3: memref<32x128xf32, #tpu.memory_space<vmem>>, %arg4: memref<32x128xi8, #tpu.memory_space<vmem>>, %arg5: memref<1x8x128xf32, #tpu.memory_space<vmem>>, %arg6: memref<32x1xf32, #tpu.memory_space<vmem>>, %arg7: memref<32x1xf32, #tpu.memory_space<vmem>>) attributes {dimension_semantics = [#tpu.dimension_semantics<parallel>, #tpu.dimension_semantics<arbitrary>], iteration_bounds = array<i64: 1, 1>, scalar_prefetch = 0 : i64, scratch_operands = 2 : i64, tpu.core_type = #tpu.core_type<tc>, window_params = [{transform_indices = @transform_0, window_bounds = array<i64: 32, 128>}, {transform_indices = @transform_1, window_bounds = array<i64: 32, 128>}, {transform_indices = @transform_2, window_bounds = array<i64: 32, 128>}, {transform_indices = @transform_3, window_bounds = array<i64: 1, 8, 128>}]} {
    %c0_i32 = arith.constant 0 : i32
    %0 = arith.cmpi eq, %arg1, %c0_i32 : i32
    %1 = arith.extui %0 : i1 to i32
    %c0_i32_0 = arith.constant 0 : i32
    %2 = arith.cmpi ne, %1, %c0_i32_0 : i32
    scf.if %2 {
      %cst_19 = arith.constant 0.000000e+00 : f32
      %41 = vector.broadcast %cst_19 : f32 to vector<32x1xf32>
      %c0_20 = arith.constant 0 : index
      %c0_21 = arith.constant 0 : index
      %42 = vector.load %arg6[%c0_20, %c0_21] : memref<32x1xf32, #tpu.memory_space<vmem>>, vector<32x1xf32>
      tpu.vector_store %arg6[%c0_20, %c0_21], %41 {strides = array<i32>} : memref<32x1xf32, #tpu.memory_space<vmem>>, vector<32x1xf32>,
      %cst_22 = arith.constant 0.000000e+00 : f32
      %43 = vector.broadcast %cst_22 : f32 to vector<32x1xf32>
      %c0_23 = arith.constant 0 : index
      %c0_24 = arith.constant 0 : index
      %44 = vector.load %arg7[%c0_23, %c0_24] : memref<32x1xf32, #tpu.memory_space<vmem>>, vector<32x1xf32>
      tpu.vector_store %arg7[%c0_23, %c0_24], %43 {strides = array<i32>} : memref<32x1xf32, #tpu.memory_space<vmem>>, vector<32x1xf32>,
    } else {
    }
    %c0 = arith.constant 0 : index
    %c0_1 = arith.constant 0 : index
    %3 = vector.load %arg2[%c0, %c0_1] : memref<32x128xf32, #tpu.memory_space<vmem>>, vector<32x128xf32>
    %c0_2 = arith.constant 0 : index
    %c0_3 = arith.constant 0 : index
    %4 = vector.load %arg3[%c0_2, %c0_3] : memref<32x128xf32, #tpu.memory_space<vmem>>, vector<32x128xf32>
    %c0_4 = arith.constant 0 : index
    %c0_5 = arith.constant 0 : index
    %5 = vector.load %arg4[%c0_4, %c0_5] : memref<32x128xi8, #tpu.memory_space<vmem>>, vector<32x128xi8>
    %6 = arith.sitofp %5 : vector<32x128xi8> to vector<32x128xf32>
    %c32_i32 = arith.constant 32 : i32
    %7 = arith.muli %arg0, %c32_i32 : i32
    %8 = tpu.iota {dimensions = array<i32: 0>} : vector<32x128xi32>
    %9 = vector.broadcast %7 : i32 to vector<32x128xi32>
    %10 = arith.addi %9, %8 : vector<32x128xi32>
    %c128_i32 = arith.constant 128 : i32
    %11 = arith.muli %arg1, %c128_i32 : i32
    %12 = tpu.iota {dimensions = array<i32: 1>} : vector<32x128xi32>
    %13 = vector.broadcast %11 : i32 to vector<32x128xi32>
    %14 = arith.addi %13, %12 : vector<32x128xi32>
    %c2_i32 = arith.constant 2 : i32
    %15 = vector.broadcast %c2_i32 : i32 to vector<32x128xi32>
    %16 = arith.cmpi slt, %10, %15 : vector<32x128xi32>
    %c16_i32 = arith.constant 16 : i32
    %17 = vector.broadcast %c16_i32 : i32 to vector<32x128xi32>
    %18 = arith.cmpi slt, %14, %17 : vector<32x128xi32>
    %19 = arith.andi %16, %18 : vector<32x128xi1>
    %20 = arith.subf %3, %4 : vector<32x128xf32>
    %21 = arith.subf %3, %4 : vector<32x128xf32>
    %22 = arith.mulf %20, %21 : vector<32x128xf32>
    %cst = arith.constant 0.000000e+00 : f32
    %23 = vector.broadcast %cst : f32 to vector<32x128xf32>
    %24 = arith.select %19, %6, %23 : vector<32x128xi1>, vector<32x128xf32>
    %cst_6 = arith.constant 0.000000e+00 : f32
    %25 = vector.broadcast %cst_6 : f32 to vector<32x128xf32>
    %26 = arith.select %19, %22, %25 : vector<32x128xi1>, vector<32x128xf32>
    %c0_7 = arith.constant 0 : index
    %c0_8 = arith.constant 0 : index
    %27 = vector.load %arg6[%c0_7, %c0_8] : memref<32x1xf32, #tpu.memory_space<vmem>>, vector<32x1xf32>
    %28 = arith.mulf %26, %24 : vector<32x128xf32>
    %cst_9 = arith.constant dense<0.000000e+00> : vector<32xf32>
    %29 = vector.multi_reduction <add>, %28, %cst_9 [1] : vector<32x128xf32> to vector<32xf32>
    %30 = vector.shape_cast %29 : vector<32xf32> to vector<32x1xf32>
    %31 = arith.addf %27, %30 : vector<32x1xf32>
    %c0_10 = arith.constant 0 : index
    %c0_11 = arith.constant 0 : index
    %32 = vector.load %arg6[%c0_10, %c0_11] : memref<32x1xf32, #tpu.memory_space<vmem>>, vector<32x1xf32>
    tpu.vector_store %arg6[%c0_10, %c0_11], %31 {strides = array<i32>} : memref<32x1xf32, #tpu.memory_space<vmem>>, vector<32x1xf32>,
    %c0_12 = arith.constant 0 : index
    %c0_13 = arith.constant 0 : index
    %33 = vector.load %arg7[%c0_12, %c0_13] : memref<32x1xf32, #tpu.memory_space<vmem>>, vector<32x1xf32>
    %cst_14 = arith.constant dense<0.000000e+00> : vector<32xf32>
    %34 = vector.multi_reduction <add>, %24, %cst_14 [1] : vector<32x128xf32> to vector<32xf32>
    %35 = vector.shape_cast %34 : vector<32xf32> to vector<32x1xf32>
    %36 = arith.addf %33, %35 : vector<32x1xf32>
    %c0_15 = arith.constant 0 : index
    %c0_16 = arith.constant 0 : index
    %37 = vector.load %arg7[%c0_15, %c0_16] : memref<32x1xf32, #tpu.memory_space<vmem>>, vector<32x1xf32>
    tpu.vector_store %arg7[%c0_15, %c0_16], %36 {strides = array<i32>} : memref<32x1xf32, #tpu.memory_space<vmem>>, vector<32x1xf32>,
    %c0_i32_17 = arith.constant 0 : i32
    %38 = arith.cmpi eq, %arg1, %c0_i32_17 : i32
    %39 = arith.extui %38 : i1 to i32
    %c0_i32_18 = arith.constant 0 : i32
    %40 = arith.cmpi ne, %39, %c0_i32_18 : i32
    scf.if %40 {
      %c32_i32_19 = arith.constant 32 : i32
      %41 = arith.muli %arg0, %c32_i32_19 : i32
      %42 = tpu.iota {dimensions = array<i32: 0>} : vector<32x1xi32>
      %43 = vector.broadcast %41 : i32 to vector<32x1xi32>
      %44 = arith.addi %43, %42 : vector<32x1xi32>
      %c2_i32_20 = arith.constant 2 : i32
      %45 = vector.broadcast %c2_i32_20 : i32 to vector<32x1xi32>
      %46 = arith.cmpi slt, %44, %45 : vector<32x1xi32>
      %c0_21 = arith.constant 0 : index
      %c0_22 = arith.constant 0 : index
      %47 = vector.load %arg6[%c0_21, %c0_22] : memref<32x1xf32, #tpu.memory_space<vmem>>, vector<32x1xf32>
      %c0_23 = arith.constant 0 : index
      %c0_24 = arith.constant 0 : index
      %48 = vector.load %arg7[%c0_23, %c0_24] : memref<32x1xf32, #tpu.memory_space<vmem>>, vector<32x1xf32>
      %cst_25 = arith.constant 1.000000e+00 : f32
      %49 = vector.broadcast %cst_25 : f32 to vector<32x1xf32>
      %50 = arith.select %46, %48, %49 : vector<32x1xi1>, vector<32x1xf32>
      %51 = arith.divf %47, %50 : vector<32x1xf32>
      %52 = vector.shape_cast %51 : vector<32x1xf32> to vector<1x32x1xf32>
      %cst_26 = arith.constant dense<0.000000e+00> : vector<1xf32>
      %53 = vector.multi_reduction <add>, %52, %cst_26 [1, 2] : vector<1x32x1xf32> to vector<1xf32>
      %54 = vector.shape_cast %53 : vector<1xf32> to vector<1x1x1xf32>
      %55 = vector.extract %54[0, 0, 0] : f32 from vector<1x1x1xf32>
      %56 = vector.broadcast %55 : f32 to vector<1x1xf32>
      %57 = vector.shape_cast %56 : vector<1x1xf32> to vector<1x1x1xf32>
      %58 = vector.shape_cast %57 : vector<1x1x1xf32> to vector<1x1x1xf32>
      %59 = vector.broadcast %58 : vector<1x1x1xf32> to vector<1x8x128xf32>
      %c0_27 = arith.constant 0 : index
      %c0_28 = arith.constant 0 : index
      %c0_29 = arith.constant 0 : index
      %60 = vector.load %arg5[%c0_27, %c0_28, %c0_29] : memref<1x8x128xf32, #tpu.memory_space<vmem>>, vector<1x8x128xf32>
      tpu.vector_store %arg5[%c0_27, %c0_28, %c0_29], %59 {strides = array<i32>} : memref<1x8x128xf32, #tpu.memory_space<vmem>>, vector<1x8x128xf32>,
    } else {
    }
    return
  }
  func.func @transform_0(%arg0: i32, %arg1: i32) -> (i32, i32) {
    %c0_i32 = arith.constant 0 : i32
    return %arg0, %arg1 : i32, i32
  }
  func.func @transform_1(%arg0: i32, %arg1: i32) -> (i32, i32) {
    %c0_i32 = arith.constant 0 : i32
    return %arg0, %arg1 : i32, i32
  }
  func.func @transform_2(%arg0: i32, %arg1: i32) -> (i32, i32) {
    %c0_i32 = arith.constant 0 : i32
    return %arg0, %arg1 : i32, i32
  }
  func.func @transform_3(%arg0: i32, %arg1: i32) -> (i32, i32, i32) {
    %c0_i32 = arith.constant 0 : i32
    %c0_i32_0 = arith.constant 0 : i32
    %c0_i32_1 = arith.constant 0 : i32
    return %arg0, %c0_i32, %c0_i32_0 : i32, i32, i32
  }
}

</mosaic_0001>

<bundles_post_ra>
// kernel: tpu_custom_call.1
= control target key start
LH: loop header
LB: loop body
LE: loop exit
PB: predicated region body
PF: predicated region fallthrough
CT: control target
= control target key end

     0   :  { %8 = vsyncpa [#allocation5], 0  ;;  %s383_s0 = inlined_call_operand.hbm [shape: f32[2,16], index: 0, kind: input, shape index: {}]   ;;  %s384_s1 = inlined_call_operand.vmem [shape: f32[2,16], index: 1, kind: input, shape index: {}]   ;;  %s385_s2 = inlined_call_operand.vmem [shape: s8[2,16], index: 2, kind: input, shape index: {}]   ;;  %s386_s3 = inlined_call_operand.hbm [shape: f32[1,8,128], index: 3, kind: output, shape index: {}]  }
   0x1   :  { %9 = vsyncpa [#allocation6], 0 }
   0x2   :  { %14 = vsyncadd [#allocation5], 480  ;;  %s289_s12 = smov [#allocation4]   ;;  %s241_s16 = scalar_lea.hbm %s383_s0, 32 }
   0x3   :  { %s15_s13 = sshll.u32 %s289_s12, 4  ;;  %p242_p0 = scmp.ne.s32.totalorder %s383_s0, %s241_s16  ;;  %s16_s13 = int_to_ptr.vmem [resolvable:$true] %s15_s13 }
   0x4   :  { %p245_p1 = scmp.lt.u32.totalorder %s241_s16, %s383_s0 }
   0x6   :  { %p247_p2 = pnand %p245_p1, %p242_p0 }
   0x8   :  { %250 = shalt.err (!%p247_p2)
}
   0x9   :  { %s251_s21 = scalar_lea.vmem %s16_s13, 32  ;;  %s255_s22 = scalar_lea.vmem %s16_s13, 512 }
   0xa   :  { %p252_p3 = scmp.ne.s32.totalorder %s16_s13, %s251_s21  ;;  %p256_p4 = scmp.lt.s32.totalorder %s16_s13, %s16_s13 }
   0xb   :  { %p257_p5 = scmp.lt.s32.totalorder %s255_s22, %s251_s21 }
   0xd   :  { %p258_p6 = por %p257_p5, %p256_p4 }
   0xf   :  { %p259_p7 = pnand %p258_p6, %p252_p3 }
  0x11   :  { %262 = shalt.err (!%p259_p7)
}
  0x12   :  { %s290_s23 = smov 32   ;;  %s291_s24 = smov 2  }
  0x13   :  { %21 = dma.hbm_to_vmem [thread:$0]  %s383_s0, 32, %s16_s13, [#allocation5], %s290_s23, %s290_s23, %s291_s24  }
  0x14   :  { %285 = dma.done.wait [#allocation5], 512  }
  0x15   :  { %286 = vsyncadd [#allocation5], 4294966784  ;;  %v75_v0 = vlaneseq  ;;  %vm33_vm0 = vcmask 7168   ;;  %v292_v1 = vmov 0.0   ;;  %v50_v4 = vld [vmem:[%s385_s2] sm:$0x1] }
  0x16   :  { %141 = vadd.xlane.f32.xlu1 %v292_v1  ;;  %38 = vst.msk [vmem:[#allocation3] sm:$0xff] %vm33_vm0, %v292_v1  ;;  %34 = vst.msk [vmem:[#allocation2] sm:$0xff] %vm33_vm0, %v292_v1  ;;  %v51_v5 = vld [vmem:[%s385_s2 + $0x1] sm:$0x1]  ;;  %v58_v7 = vunpack.c.0.s8 %v50_v4 }
  0x17   :  { %35 = vst.msk [vmem:[#allocation2 + $0x8] sm:$0xff] %vm33_vm0, %v292_v1  ;;  %36 = vst.msk [vmem:[#allocation2 + $0x10] sm:$0xff] %vm33_vm0, %v292_v1  ;;  %v76_v2 = vshrl.u32 %v75_v0, 7  ;;  %v87_v3 = vand.u32 127, %v75_v0  ;;  %v42_v6 = vld [vmem:[#allocation4] sm:$0xff]  ;;  %v59_v8 = vunpack.c.0.s8 %v51_v5 }
  0x18   :  { %37 = vst.msk [vmem:[#allocation2 + $0x18] sm:$0xff] %vm33_vm0, %v292_v1  ;;  %39 = vst.msk [vmem:[#allocation3 + $0x8] sm:$0xff] %vm33_vm0, %v292_v1  ;;  %v46_v9 = vld [vmem:[%s384_s1] sm:$0xff]  ;;  %v66_v11 = vcvt.s32.f32 %v58_v7  ;;  %s293_s1 = smov [#allocation7]  }
  0x19   :  { %40 = vst.msk [vmem:[#allocation3 + $0x10] sm:$0xff] %vm33_vm0, %v292_v1  ;;  %41 = vst.msk [vmem:[#allocation3 + $0x18] sm:$0xff] %vm33_vm0, %v292_v1  ;;  %vm90_vm1 = vcmp.lt.s32.totalorder %v76_v2, 2  ;;  %vm94_vm2 = vcmp.lt.s32.totalorder %v87_v3, 16  ;;  %v99_v10 = vsub.f32 %v42_v6, %v46_v9  ;;  %v67_v12 = vcvt.s32.f32 %v59_v8  ;;  %s223_s2 = sshll.u32 %s293_s1, 4  ;;  %s224_s2 = int_to_ptr.vmem [resolvable:$true] %s223_s2 }
  0x1a   :  { %143 = vadd.xlane.f32.xlu1 %v292_v1  ;;  %vm95_vm3 = vmand %vm90_vm1, %vm94_vm2  ;;  %s263_s6 = scalar_lea.vmem %s224_s2, 128  ;;  %p268_p9 = scmp.lt.s32.totalorder %s224_s2, %s224_s2 }
  0x1b   :  { %v103_v13 = vmul.f32 %v99_v10, %v99_v10  ;;  %v115_v14 = vcombine.low %v66_v11, %v67_v12  ;;  %p264_p8 = scmp.ne.s32.totalorder %s224_s2, %s263_s6  ;;  %p269_p10 = scmp.lt.s32.totalorder %s263_s6, %s263_s6 }
  0x1d   :  { %v127_v15 = vsel %vm95_vm3, %v103_v13, 0.0  ;;  %v123_v16 = vsel %vm95_vm3, %v115_v14, 0.0  ;;  %v156_v24 = vld [vmem:[#allocation3] sm:$0xff]  ;;  %p270_p11 = por %p269_p10, %p268_p9 }
  0x1e   :  { %160 = vadd.xlane.f32.xlu0 %v123_v16  ;;  %v135_v17 = vmul.f32 %v127_v15, %v123_v16  ;;  %v132_v18 = vld [vmem:[#allocation2 + $0x8] sm:$0xff]  ;;  %v133_v21 = vld [vmem:[#allocation2 + $0x10] sm:$0xff]  ;;  %v131_v27 = vld [vmem:[#allocation2] sm:$0xff] }
  0x1f   :  { %v134_v30 = vld [vmem:[#allocation2 + $0x18] sm:$0xff]  ;;  %v157_v49 = vld [vmem:[#allocation3 + $0x8] sm:$0xff]  ;;  %p271_p12 = pnand %p270_p11, %p264_p8 }
  0x20   :  { %v159_v51 = vld [vmem:[#allocation3 + $0x18] sm:$0xff]  ;;  %v158_v56 = vld [vmem:[#allocation3 + $0x10] sm:$0xff] }
  0x22   :  { %139 = vadd.xlane.f32.xlu0 %v135_v17 }
  0x26   :  { %145 = vadd.xlane.f32.xlu0 %v292_v1 }
  0x2a   :  { %162 = vadd.xlane.f32.xlu0 %v292_v1 }
  0x2e   :  { %166 = vadd.xlane.f32.xlu0 %v292_v1 }
  0xa3   :  { %v142_v19 = vpop.xlane.xlu1 %141 }
  0xa4   :  { %v148_v20 = vadd.f32 %v142_v19, %v132_v18 }
  0xa6   :  { %153 = vst.msk [vmem:[#allocation2 + $0x8] sm:$0xff] %vm33_vm0, %v148_v20 }
  0xa7   :  { %v144_v22 = vpop.xlane.xlu1 %143 }
  0xa8   :  { %v149_v23 = vadd.f32 %v144_v22, %v133_v21 }
  0xaa   :  { %154 = vst.msk [vmem:[#allocation2 + $0x10] sm:$0xff] %vm33_vm0, %v149_v23 }
  0xab   :  { %v161_v25 = vpop.xlane.xlu0 %160 }
  0xac   :  { %v168_v26 = vadd.f32 %v161_v25, %v156_v24 }
  0xad   :  { %v180_v37 = vld [vmem:[#allocation2 + $0x8] sm:$0xff] }
  0xae   :  { %172 = vst.msk [vmem:[#allocation3] sm:$0xff] %vm33_vm0, %v168_v26  ;;  %v200_v42 = vsel %vm33_vm0, %v180_v37, 0.0 }
  0xaf   :  { %v140_v28 = vpop.xlane.xlu0 %139 }
  0xb0   :  { %v147_v29 = vadd.f32 %v140_v28, %v131_v27 }
  0xb1   :  { %v181_v38 = vld [vmem:[#allocation2 + $0x10] sm:$0xff] }
  0xb2   :  { %152 = vst.msk [vmem:[#allocation2] sm:$0xff] %vm33_vm0, %v147_v29  ;;  %v202_v43 = vsel %vm33_vm0, %v181_v38, 0.0 }
  0xb3   :  { %v146_v31 = vpop.xlane.xlu0 %145 }
  0xb4   :  { %v150_v32 = vadd.f32 %v146_v31, %v134_v30 }
  0xb5   :  { %v183_v33 = vld [vmem:[#allocation3] sm:$0xff] }
  0xb6   :  { %155 = vst.msk [vmem:[#allocation2 + $0x18] sm:$0xff] %vm33_vm0, %v150_v32  ;;  %v187_v34 = vsel %vm90_vm1, %v183_v33, 1.0 }
  0xb7   :  { %239 = vrcp.f32 %v187_v34  ;;  %v163_v48 = vpop.xlane.xlu0 %162 }
  0xb8   :  { %v169_v50 = vadd.f32 %v163_v48, %v157_v49 }
  0xb9   :  { %v179_v35 = vld [vmem:[#allocation2] sm:$0xff] }
  0xba   :  { %173 = vst.msk [vmem:[#allocation3 + $0x8] sm:$0xff] %vm33_vm0, %v169_v50 }
  0xbb   :  { %v167_v52 = vpop.xlane.xlu0 %166 }
  0xbc   :  { %v171_v53 = vadd.f32 %v167_v52, %v159_v51 }
  0xbd   :  { %v182_v40 = vld [vmem:[#allocation2 + $0x18] sm:$0xff] }
  0xbe   :  { %v204_v45 = vsel %vm33_vm0, %v182_v40, 0.0  ;;  %175 = vst.msk [vmem:[#allocation3 + $0x18] sm:$0xff] %vm33_vm0, %v171_v53 }
  0xc1   :  { %v240_v36 = vpop.eup %239 }
  0xc2   :  { %v192_v39 = vmul.f32 %v240_v36, %v179_v35 }
  0xc4   :  { %v199_v41 = vsel %vm33_vm0, %v192_v39, 0.0 }
  0xc5   :  { %v201_v44 = vadd.f32 %v200_v42, %v199_v41 }
  0xc7   :  { %v203_v46 = vadd.f32 %v202_v43, %v201_v44 }
  0xc9   :  { %v205_v47 = vadd.f32 %v204_v45, %v203_v46 }
  0xcb   :  { %206 = vadd.xlane.f32.xlu1 %v205_v47 }
  0xcf   :  { %164 = vadd.xlane.f32.xlu1 %v292_v1 }
 0x158   :  { %v207_v54 = vpop.xlane.xlu1 %206 }
 0x159   :  { %v208_v55 = vrot.slane %v207_v54, 4 }
 0x15b   :  { %v209_v57 = vadd.f32 %v208_v55, %v207_v54 }
 0x15c   :  { %v165_v58 = vpop.xlane.xlu1 %164 }
 0x15d   :  { %v210_v59 = vrot.slane %v209_v57, 2  ;;  %v170_v60 = vadd.f32 %v165_v58, %v158_v56 }
 0x15f   :  { %v211_v61 = vadd.f32 %v210_v59, %v209_v57  ;;  %174 = vst.msk [vmem:[#allocation3 + $0x10] sm:$0xff] %vm33_vm0, %v170_v60 }
 0x161   :  { %v212_v62 = vrot.slane %v211_v61, 1 }
 0x163   :  { %v213_v63 = vadd.f32 %v212_v62, %v211_v61 }
 0x165   :  { %232 = vpush %v213_v63 }
 0x196   :  { %s233_s5 = spop %232 }
 0x197   :  { %v215_v0 = vstv %s233_s5 }
 0x198   :  { %216 = vst [vmem:[#allocation7] sm:$0xff] %v215_v0 }
 0x199   :  { %274 = shalt.err (!%p271_p12)
}
 0x19a   :  { %s275_s9 = scalar_lea.hbm %s386_s3, 128 }
 0x19b   :  { %p276_p13 = scmp.ne.s32.totalorder %s386_s3, %s275_s9  ;;  %p279_p0 = scmp.lt.u32.totalorder %s275_s9, %s386_s3 }
 0x19d   :  { %p281_p1 = pnand %p279_p0, %p276_p13 }
 0x19f   :  { %284 = shalt.err (!%p281_p1)
}
 0x1a0   :  { %226 = dma.vmem_to_hbm [thread:$0]  %s224_s2, 128, %s386_s3, [#allocation6]  }
 0x1a1   :  { %287 = dma.done.wait [#allocation6], 128  }
 0x1a2   :  { %288 = vsyncadd [#allocation6], 4294967168 }
 0x1a3   :  { %230 = vsyncpa [#allocation5], 1 }
 0x1a4   :  { %231 = vsyncpa [#allocation6], 1 }

</bundles_post_ra>
